<compile_context>
chip_gen: v7x
topology: tpu7x:2x2x1
jax: 0.10.0
libtpu: 0.0.40
codegen_flags: <defaults>
</compile_context>

<pallas_src>
import functools

import jax
import jax.numpy as jnp
from jax.experimental import pallas as pl
from jax.experimental.pallas import tpu as pltpu


def _round_up(x, m):
    return ((x + m - 1) // m) * m


# ---------------------------------------------------------------------------
# Tile selection (all static, shape-driven)
# ---------------------------------------------------------------------------
def _pick_k_tile(D, cap=2048):
    """Contraction tile. Take the whole K in one step when it fits."""
    D_pad = _round_up(D, 128)
    if D_pad <= cap:
        return D_pad, D_pad
    best_t, best_pad = None, None
    for t in (2048, 1024, 512, 256):
        pad = _round_up(D, t)
        if best_pad is None or pad < best_pad:
            best_t, best_pad = t, pad
    return best_t, best_pad


def _pick_c_tile(C, cap=1024):
    """Class (lane) tile. Prefer >=2 tiles of >=256 lanes for v7x dual-TC."""
    C_pad = _round_up(C, 128)
    if C_pad <= cap:
        tn = C_pad
        t = 256
        while t * 2 <= C_pad:
            if C_pad % t == 0:
                tn = t  # largest divisor >=256 giving >=2 tiles
            t += 128
        return tn, C_pad
    best_t, best_pad = None, None
    for t in (1024, 512, 256):
        pad = _round_up(C, t)
        if best_pad is None or pad < best_pad:
            best_t, best_pad = t, pad
    return best_t, best_pad


def _pick_m_tile(B, cap=512):
    """Batch tile. 16-row rounding (bf16 packing); minimize B padding."""
    B16 = _round_up(B, 16)
    if B16 <= 128:
        return B16, B16
    best_t, best_pad = None, None
    for t in (512, 256, 128):
        if t > cap:
            continue
        pad = _round_up(B, t)
        if best_pad is None or pad < best_pad or (pad == best_pad and t > best_t):
            best_t, best_pad = t, pad
    return best_t, best_pad


# ---------------------------------------------------------------------------
# Kernel
# ---------------------------------------------------------------------------
def linear_kernel(x_ref, w_ref, b_ref, o_ref, acc_ref):
    k = pl.program_id(2)

    @pl.when(k == 0)
    def _():
        # Fold the bias into the accumulator init; epilogue is a pure cast+store.
        acc_ref[...] = jnp.broadcast_to(b_ref[...], acc_ref.shape)

    acc_ref[...] += jnp.dot(
        x_ref[...], w_ref[...], preferred_element_type=jnp.float32
    )

    @pl.when(k == pl.num_programs(2) - 1)
    def _():
        o_ref[...] = acc_ref[...].astype(o_ref.dtype)


# ---------------------------------------------------------------------------
# Parameter preparation (one-time: cast + pad W and bias)
# ---------------------------------------------------------------------------
def init_params(key, input_dim, class_num):
    # weights_init_classifier: Linear weight ~ Normal(std=0.001), bias = 0.
    w = 0.001 * jax.random.normal(key, (class_num, input_dim), dtype=jnp.float32)
    b = jnp.zeros((class_num,), dtype=jnp.float32)
    # store transposed (D, C) for the kernel
    return w.T, b


def prepare_params(w_t, b, *, compute_dtype=jnp.bfloat16):
    """One-time: pad W to (D_pad, C_pad) in compute_dtype, bias to (1, C_pad) f32."""
    D, C = w_t.shape
    tk, D_pad = _pick_k_tile(D)
    tn, C_pad = _pick_c_tile(C)
    del tk, tn  # re-derived (deterministically) inside the wrapper
    w_p = jnp.pad(w_t.astype(compute_dtype), ((0, D_pad - D), (0, C_pad - C)))
    b_p = jnp.pad(b.astype(jnp.float32).reshape(1, C), ((0, 0), (0, C_pad - C)))
    return w_p, b_p


# ---------------------------------------------------------------------------
# Forward pass
# ---------------------------------------------------------------------------
@functools.partial(jax.jit, static_argnames=("class_num",))
def simple_classifier(x, w_p, b_p, *, class_num):
    """x: (B, D), w_p: (D_pad, C_pad) prepared, b_p: (1, C_pad) f32 -> (B, class_num)."""
    B, D = x.shape
    C = class_num

    tk, D_pad = _pick_k_tile(D)
    tn, C_pad = _pick_c_tile(C)
    tm, B_pad = _pick_m_tile(B)

    assert w_p.shape == (D_pad, C_pad), (w_p.shape, (D_pad, C_pad))
    assert b_p.shape == (1, C_pad), (b_p.shape, (1, C_pad))

    compute_dtype = w_p.dtype
    # Only x is touched per call (W / bias were prepared once at init).
    x_p = jnp.pad(x.astype(compute_dtype), ((0, B_pad - B), (0, D_pad - D)))

    grid = (B_pad // tm, C_pad // tn, D_pad // tk)

    cost = pl.CostEstimate(
        flops=2 * B_pad * C_pad * D_pad,
        transcendentals=0,
        bytes_accessed=(
            x_p.size * x_p.dtype.itemsize
            + w_p.size * w_p.dtype.itemsize
            + b_p.size * b_p.dtype.itemsize
            + B_pad * C_pad * x.dtype.itemsize
        ),
    )

    out_pad = pl.pallas_call(
        linear_kernel,
        out_shape=jax.ShapeDtypeStruct((B_pad, C_pad), x.dtype),
        grid=grid,
        in_specs=[
            pl.BlockSpec((tm, tk), lambda i, j, k: (i, k)),
            pl.BlockSpec((tk, tn), lambda i, j, k: (k, j)),
            pl.BlockSpec((1, tn), lambda i, j, k: (0, j)),
        ],
        out_specs=pl.BlockSpec((tm, tn), lambda i, j, k: (i, j)),
        scratch_shapes=[pltpu.VMEM((tm, tn), jnp.float32)],
        compiler_params=pltpu.CompilerParams(
            dimension_semantics=("parallel", "parallel", "arbitrary"),
            # Working set is ~20 MiB double-buffered at max tiles; 48 MiB limit
            # is safe on v7x (64 MiB physical) and raises the v5e/v6e scoped
            # default so Mosaic never constrains these tiles.
            vmem_limit_bytes=48 * 1024 * 1024,
        ),
        cost_estimate=cost,
    )(x_p, w_p, b_p)

    return out_pad[:B, :C]


if __name__ == "__main__":
    key = jax.random.PRNGKey(0)
    k_x, k_w = jax.random.split(key)

    batch, input_dim, class_num = 8, 32, 16
    x = jax.random.normal(k_x, (batch, input_dim), dtype=jnp.float32)
    w_t, b = init_params(k_w, input_dim, class_num)

    # Default (performance) path: bf16 weights prepared once, f32 accumulation.
    w_bf16, b_pad = prepare_params(w_t, b)
    out = jax.block_until_ready(
        simple_classifier(x, w_bf16, b_pad, class_num=class_num)
    )
    assert out.shape == (batch, class_num)
    assert out.dtype == jnp.float32

    # Full-precision path for a tight numerical check.
    w_f32, b_pad32 = prepare_params(w_t, b, compute_dtype=jnp.float32)
    out_f32 = jax.block_until_ready(
        simple_classifier(x, w_f32, b_pad32, class_num=class_num)
    )

    ref = x @ w_t + b
    ref_bf16 = (
        x.astype(jnp.bfloat16).astype(jnp.float32)
        @ w_t.astype(jnp.bfloat16).astype(jnp.float32)
        + b
    )

    assert jnp.allclose(out_f32, ref, atol=1e-5, rtol=1e-5)
    assert jnp.allclose(out, ref_bf16, atol=1e-5, rtol=1e-5)
    # Loose cross-check only valid at these tiny init magnitudes (std=0.001).
    assert jnp.allclose(out, ref, atol=1e-3)

    print("KERNEL_OK")
</pallas_src>

<mosaic_0001>
module attributes {stable_mosaic.version = 11 : i64} {
  func.func @linear_kernel(%arg0: i32, %arg1: i32, %arg2: i32, %arg3: memref<16x128xbf16, #tpu.memory_space<vmem>>, %arg4: memref<128x128xbf16, #tpu.memory_space<vmem>>, %arg5: memref<1x128xf32, #tpu.memory_space<vmem>>, %arg6: memref<16x128xf32, #tpu.memory_space<vmem>>, %arg7: memref<16x128xf32, #tpu.memory_space<vmem>>) attributes {dimension_semantics = [#tpu.dimension_semantics<parallel>, #tpu.dimension_semantics<parallel>, #tpu.dimension_semantics<arbitrary>], iteration_bounds = array<i64: 1, 1, 1>, scalar_prefetch = 0 : i64, scratch_operands = 1 : i64, tpu.core_type = #tpu.core_type<tc>, window_params = [{transform_indices = @transform_0, window_bounds = array<i64: 16, 128>}, {transform_indices = @transform_1, window_bounds = array<i64: 128, 128>}, {transform_indices = @transform_2, window_bounds = array<i64: 1, 128>}, {transform_indices = @transform_3, window_bounds = array<i64: 16, 128>}]} {
    %c0_i32 = arith.constant 0 : i32
    %0 = arith.cmpi eq, %arg2, %c0_i32 : i32
    %1 = arith.extui %0 : i1 to i32
    %c0_i32_0 = arith.constant 0 : i32
    %2 = arith.cmpi ne, %1, %c0_i32_0 : i32
    scf.if %2 {
      %c0_10 = arith.constant 0 : index
      %c0_11 = arith.constant 0 : index
      %12 = vector.load %arg5[%c0_10, %c0_11] : memref<1x128xf32, #tpu.memory_space<vmem>>, vector<1x128xf32>
      %13 = vector.shape_cast %12 : vector<1x128xf32> to vector<1x128xf32>
      %14 = vector.broadcast %13 : vector<1x128xf32> to vector<16x128xf32>
      %c0_12 = arith.constant 0 : index
      %c0_13 = arith.constant 0 : index
      %15 = vector.load %arg7[%c0_12, %c0_13] : memref<16x128xf32, #tpu.memory_space<vmem>>, vector<16x128xf32>
      tpu.vector_store %arg7[%c0_12, %c0_13], %14 {strides = array<i32>} : memref<16x128xf32, #tpu.memory_space<vmem>>, vector<16x128xf32>,
    } else {
    }
    %c0 = arith.constant 0 : index
    %c0_1 = arith.constant 0 : index
    %3 = vector.load %arg7[%c0, %c0_1] : memref<16x128xf32, #tpu.memory_space<vmem>>, vector<16x128xf32>
    %c0_2 = arith.constant 0 : index
    %c0_3 = arith.constant 0 : index
    %4 = vector.load %arg3[%c0_2, %c0_3] : memref<16x128xbf16, #tpu.memory_space<vmem>>, vector<16x128xbf16>
    %c0_4 = arith.constant 0 : index
    %c0_5 = arith.constant 0 : index
    %5 = vector.load %arg4[%c0_4, %c0_5] : memref<128x128xbf16, #tpu.memory_space<vmem>>, vector<128x128xbf16>
    %cst = arith.constant dense<0.000000e+00> : vector<16x128xf32>
    %6 = tpu.matmul %4, %5, %cst {dimension_numbers = #tpu.dot_dimension_numbers<[1], [0], [0], [1], [0, 0, 1, 1], [], []>} : vector<16x128xbf16>, vector<128x128xbf16>, vector<16x128xf32> -> vector<16x128xf32>
    %7 = arith.addf %3, %6 : vector<16x128xf32>
    %c0_6 = arith.constant 0 : index
    %c0_7 = arith.constant 0 : index
    %8 = vector.load %arg7[%c0_6, %c0_7] : memref<16x128xf32, #tpu.memory_space<vmem>>, vector<16x128xf32>
    tpu.vector_store %arg7[%c0_6, %c0_7], %7 {strides = array<i32>} : memref<16x128xf32, #tpu.memory_space<vmem>>, vector<16x128xf32>,
    %c0_i32_8 = arith.constant 0 : i32
    %9 = arith.cmpi eq, %arg2, %c0_i32_8 : i32
    %10 = arith.extui %9 : i1 to i32
    %c0_i32_9 = arith.constant 0 : i32
    %11 = arith.cmpi ne, %10, %c0_i32_9 : i32
    scf.if %11 {
      %c0_10 = arith.constant 0 : index
      %c0_11 = arith.constant 0 : index
      %12 = vector.load %arg7[%c0_10, %c0_11] : memref<16x128xf32, #tpu.memory_space<vmem>>, vector<16x128xf32>
      %c0_12 = arith.constant 0 : index
      %c0_13 = arith.constant 0 : index
      %13 = vector.load %arg6[%c0_12, %c0_13] : memref<16x128xf32, #tpu.memory_space<vmem>>, vector<16x128xf32>
      tpu.vector_store %arg6[%c0_12, %c0_13], %12 {strides = array<i32>} : memref<16x128xf32, #tpu.memory_space<vmem>>, vector<16x128xf32>,
    } else {
    }
    return
  }
  func.func @transform_0(%arg0: i32, %arg1: i32, %arg2: i32) -> (i32, i32) {
    %c0_i32 = arith.constant 0 : i32
    return %arg0, %arg2 : i32, i32
  }
  func.func @transform_1(%arg0: i32, %arg1: i32, %arg2: i32) -> (i32, i32) {
    %c0_i32 = arith.constant 0 : i32
    return %arg2, %arg1 : i32, i32
  }
  func.func @transform_2(%arg0: i32, %arg1: i32, %arg2: i32) -> (i32, i32) {
    %c0_i32 = arith.constant 0 : i32
    %c0_i32_0 = arith.constant 0 : i32
    return %c0_i32, %arg1 : i32, i32
  }
  func.func @transform_3(%arg0: i32, %arg1: i32, %arg2: i32) -> (i32, i32) {
    %c0_i32 = arith.constant 0 : i32
    return %arg0, %arg1 : i32, i32
  }
}

</mosaic_0001>

<bundles_post_ra>
// kernel: simple_classifier.1
= control target key start
LH: loop header
LB: loop body
LE: loop exit
PB: predicated region body
PF: predicated region fallthrough
CT: control target
= control target key end

     0   :  { %8 = vsyncpa [#allocation4], 0  ;;  %s250_s12 = smov [#allocation3]   ;;  %s299_s0 = inlined_call_operand.vmem [shape: bf16[16,128], index: 0, kind: input, shape index: {}]   ;;  %s300_s1 = inlined_call_operand.hbm [shape: bf16[128,128], index: 1, kind: input, shape index: {}]   ;;  %s301_s2 = inlined_call_operand.vmem [shape: f32[1,128], index: 2, kind: input, shape index: {}]   ;;  %s302_s3 = inlined_call_operand.vmem [shape: f32[16,128], index: 3, kind: output, shape index: {}]  }
   0x1   :  { %s16_s13 = sshll.u32 %s250_s12, 4  ;;  %s226_s16 = scalar_lea.hbm %s300_s1, 1024  ;;  %s17_s13 = int_to_ptr.vmem [resolvable:$true] %s16_s13 }
   0x2   :  { %p227_p0 = scmp.ne.s32.totalorder %s300_s1, %s226_s16  ;;  %p230_p1 = scmp.lt.u32.totalorder %s226_s16, %s300_s1 }
   0x4   :  { %p232_p2 = pnand %p230_p1, %p227_p0 }
   0x6   :  { %235 = shalt.err (!%p232_p2)
}
   0x7   :  { %s236_s21 = scalar_lea.vmem %s17_s13, 1024  ;;  %p241_p4 = scmp.lt.s32.totalorder %s17_s13, %s17_s13 }
   0x8   :  { %p237_p3 = scmp.ne.s32.totalorder %s17_s13, %s236_s21  ;;  %p242_p5 = scmp.lt.s32.totalorder %s236_s21, %s236_s21 }
   0xa   :  { %p243_p6 = por %p242_p5, %p241_p4 }
   0xc   :  { %p244_p7 = pnand %p243_p6, %p237_p3 }
   0xe   :  { %247 = shalt.err (!%p244_p7)
}
   0xf   :  { %s251_s22 = smov 64   ;;  %s252_s23 = smov 4  }
  0x10   :  { %22 = dma.hbm_to_vmem [thread:$0]  %s300_s1, 1024, %s17_s13, [#allocation4], %s251_s22, %s251_s22, %s252_s23  }
  0x11   :  { %248 = dma.done.wait [#allocation4], 1024  }
  0x12   :  { %249 = vsyncadd [#allocation4], 4294966272  ;;  %v253_v0 = vmov 0.0   ;;  %vm254_vm0 = vmmov 0   ;;  %v217_v1 = vld [vmem:[#allocation3] sm:$0xff]   ;;  %v218_v2 = vld [vmem:[#allocation3 + $0x8] sm:$0xff]  }
  0x13   :  { %192 = vmatprep.subr.bf16.mxu0 %v253_v0  ;;  %208 = vmatprep.mubr.msk.bf16.mxu0 %vm254_vm0, %v253_v0  ;;  %v219_v3 = vld [vmem:[#allocation3 + $0x10] sm:$0xff]   ;;  %v220_v4 = vld [vmem:[#allocation3 + $0x18] sm:$0xff]   ;;  %v221_v5 = vld [vmem:[#allocation3 + $0x20] sm:$0xff]  }
  0x14   :  { %193 = vmatpush3.bf16.msra.mxu0 %v217_v1  ;;  %v222_v6 = vld [vmem:[#allocation3 + $0x28] sm:$0xff]   ;;  %v223_v7 = vld [vmem:[#allocation3 + $0x30] sm:$0xff]   ;;  %v224_v8 = vld [vmem:[#allocation3 + $0x38] sm:$0xff]  }
  0x15   :  { %194 = vmatprep.subr.bf16.mxu0 %v253_v0  ;;  %v225_v9 = vld [vmem:[%s299_s0] sm:$0xff]  }
  0x16   :  { %v173_v10 = vld [vmem:[%s301_s2] ss:$0 sm:$0xff] }
  0x18   :  { %195 = vmatpush3.bf16.msra.mxu0 %v218_v2 }
  0x19   :  { %196 = vmatprep.subr.bf16.mxu0 %v253_v0 }
  0x1c   :  { %197 = vmatpush3.bf16.msra.mxu0 %v219_v3 }
  0x1d   :  { %198 = vmatprep.subr.bf16.mxu0 %v253_v0 }
  0x20   :  { %199 = vmatpush3.bf16.msra.mxu0 %v220_v4 }
  0x21   :  { %200 = vmatprep.subr.bf16.mxu0 %v253_v0 }
  0x24   :  { %201 = vmatpush3.bf16.msra.mxu0 %v221_v5 }
  0x25   :  { %202 = vmatprep.subr.bf16.mxu0 %v253_v0 }
  0x28   :  { %203 = vmatpush3.bf16.msra.mxu0 %v222_v6 }
  0x29   :  { %204 = vmatprep.subr.bf16.mxu0 %v253_v0 }
  0x2c   :  { %205 = vmatpush3.bf16.msra.mxu0 %v223_v7 }
  0x2d   :  { %206 = vmatprep.subr.bf16.mxu0 %v253_v0 }
  0x30   :  { %207 = vmatpush3.bf16.msra.mxu0 %v224_v8 }
  0x33   :  { %209 = vmatmul.mubr.bf16.vlgmr.msra.gmra.mrb[0].mxu0 %v225_v9 }
 0x106   :  { %v150_v11 = vpop.f32.mrb[0].mxu0 }
 0x107   :  { %v157_v12 = vadd.f32 %v173_v10, %v150_v11  ;;  %v210_v13 = vpop.f32.mrb[1].mxu0 }
 0x108   :  { %v153_v14 = vpop.f32.mrb[2].mxu0 }
 0x109   :  { %166 = vst [vmem:[%s302_s3] sm:$0xff] %v157_v12  ;;  %v158_v15 = vadd.f32 %v173_v10, %v153_v14  ;;  %v211_v16 = vpop.f32.mrb[3].mxu0 }
 0x10b   :  { %167 = vst [vmem:[%s302_s3 + $0x8] sm:$0xff] %v158_v15 }
 0x10c   :  { %172 = vsyncpa [#allocation4], 1 }

</bundles_post_ra>
